<compile_context>
chip_gen: v6e
topology: v6e:2x2x1
jax: 0.10.0
libtpu: 0.0.40
codegen_flags: <defaults>
</compile_context>

<pallas_src>
import jax
import jax.numpy as jnp
from jax import lax
from jax.experimental import pallas as pl
from jax.experimental.pallas import tpu as pltpu


def _margin_loss_kernel(r1_ref, r2_ref, out_ref, acc_ref, sq1_ref, sq2_ref):
    k = pl.program_id(0)

    @pl.when(k == 0)
    def _init():
        acc_ref[...] = jnp.zeros_like(acc_ref)
        sq1_ref[...] = jnp.zeros_like(sq1_ref)
        sq2_ref[...] = jnp.zeros_like(sq2_ref)

    r1 = r1_ref[...]  # (N1, TK)
    r2 = r2_ref[...]  # (N2, TK)

    # Raw (un-normalized) Gram matrix on the MXU. Both operands contract on
    # their last (lane) axis -> no explicit transpose copy.
    acc_ref[...] += lax.dot_general(
        r1, r2,
        dimension_numbers=(((1,), (1,)), ((), ())),
        preferred_element_type=jnp.float32)

    r1f = r1.astype(jnp.float32)
    r2f = r2.astype(jnp.float32)

    # Per-row sum of squares of r1, accumulated over K blocks: (N1, 1).
    sq1_ref[...] += jnp.sum(r1f * r1f, axis=1, keepdims=True)

    # Per-row sum of squares of r2, produced directly as a lane-dense (1, N2)
    # row via a ones-matmul, so no sublane->lane transpose is needed later.
    ones_row = jnp.ones((1, r2f.shape[1]), jnp.float32)
    sq2_ref[...] += lax.dot_general(
        ones_row, r2f * r2f,
        dimension_numbers=(((1,), (1,)), ((), ())),
        preferred_element_type=jnp.float32)

    @pl.when(k == pl.num_programs(0) - 1)
    def _finalize():
        # torch.nn.functional.normalize clamps the norm at eps=1e-12:
        #   1 / max(||x||, 1e-12) == rsqrt(max(||x||^2, 1e-24))
        inv1 = lax.rsqrt(jnp.maximum(sq1_ref[...], 1e-24))   # (N1, 1)
        inv2 = lax.rsqrt(jnp.maximum(sq2_ref[...], 1e-24))   # (1, N2)
        scores = acc_ref[...] * inv1 * inv2                  # (N1, N2)

        # target = 2 * eye - 1, built in-kernel with iota (no host eye).
        row = lax.broadcasted_iota(jnp.int32, scores.shape, 0)
        col = lax.broadcasted_iota(jnp.int32, scores.shape, 1)
        target = jnp.where(row == col, jnp.float32(1.0), jnp.float32(-1.0))

        diff = scores - target
        inv_count = jnp.float32(1.0 / float(scores.shape[0] * scores.shape[1]))
        out_ref[0, 0] = jnp.sum(diff * diff) * inv_count


def _pick_tk(d: int) -> int:
    # Stream the feature axis in lane-aligned chunks. Capped at 512 so the
    # double-buffered per-step footprint stays comfortable on v7x (64 MiB VMEM)
    # as well as v5e/v6e. Falls back to a single full-width block when D is
    # small or ragged (block_shape == full array dim satisfies tiling rules).
    for tk in (512, 256, 128):
        if d % tk == 0:
            return tk
    return d


def margin_loss(r1: jax.Array, r2: jax.Array) -> jax.Array:
    """Pallas implementation of MarginLoss.forward(r1, r2) -> scalar."""
    assert r1.ndim == 2 and r2.ndim == 2
    assert r1.shape[1] == r2.shape[1], "r1/r2 feature dims must match"
    assert r1.shape[0] == r2.shape[0], "MSE vs eye target requires same batch size"

    n1, d = r1.shape
    n2 = r2.shape[0]
    tk = _pick_tk(d)
    grid = (d // tk,)

    out = pl.pallas_call(
        _margin_loss_kernel,
        out_shape=jax.ShapeDtypeStruct((1, 1), jnp.float32),
        grid_spec=pltpu.PrefetchScalarGridSpec(
            num_scalar_prefetch=0,
            grid=grid,
            in_specs=[
                pl.BlockSpec((n1, tk), lambda k: (0, k)),
                pl.BlockSpec((n2, tk), lambda k: (0, k)),
            ],
            # Reduced scalar goes out through SMEM (no masked 1-wide VMEM store).
            out_specs=pl.BlockSpec(memory_space=pltpu.SMEM),
            scratch_shapes=[
                pltpu.VMEM((n1, n2), jnp.float32),  # Gram-matrix accumulator
                pltpu.VMEM((n1, 1), jnp.float32),   # sum(r1^2) per row
                pltpu.VMEM((1, n2), jnp.float32),   # sum(r2^2) per row (lane-dense)
            ],
        ),
        compiler_params=pltpu.CompilerParams(
            # Single grid axis is the K reduction -> "arbitrary".
            dimension_semantics=("arbitrary",),
            vmem_limit_bytes=32 * 1024 * 1024,
        ),
    )(r1, r2)
    return out[0, 0]


def margin_loss_ref(r1, r2):
    """Pure-JAX reference for correctness checking."""
    r1n = r1 / jnp.maximum(jnp.linalg.norm(r1, axis=1, keepdims=True), 1e-12)
    r2n = r2 / jnp.maximum(jnp.linalg.norm(r2, axis=1, keepdims=True), 1e-12)
    scores = r1n @ r2n.T
    target = 2.0 * jnp.eye(r1.shape[0], dtype=jnp.float32) - 1.0
    return jnp.mean((scores - target) ** 2)


if __name__ == "__main__":
    # MarginLoss has no learnable parameters (nn.MSELoss is stateless).
    key = jax.random.PRNGKey(0)
    k1, k2 = jax.random.split(key)

    # Small shape consistent with the module: batch of 8 embeddings, dim 32.
    N, D = 8, 32
    r1 = jax.random.normal(k1, (N, D), dtype=jnp.float32)
    r2 = jax.random.normal(k2, (N, D), dtype=jnp.float32)
    loss = jax.jit(margin_loss)(r1, r2)
    jax.block_until_ready(loss)
    ref = margin_loss_ref(r1, r2)
    assert jnp.allclose(loss, ref, rtol=1e-5, atol=1e-5), (loss, ref)

    # Second check that exercises the K-streaming grid (3 K-steps of 512).
    k3, k4 = jax.random.split(k2)
    N2, D2 = 16, 1536
    r1b = jax.random.normal(k3, (N2, D2), dtype=jnp.float32)
    r2b = jax.random.normal(k4, (N2, D2), dtype=jnp.float32)
    loss_b = jax.jit(margin_loss)(r1b, r2b)
    jax.block_until_ready(loss_b)
    ref_b = margin_loss_ref(r1b, r2b)
    # Looser tolerance: MXU pass precision for f32 may differ between the
    # Pallas path and the XLA reference matmul at larger D.
    assert jnp.allclose(loss_b, ref_b, rtol=5e-3, atol=5e-3), (loss_b, ref_b)

    print("KERNEL_OK")
</pallas_src>

<mosaic_0001>
module attributes {stable_mosaic.version = 11 : i64} {
  func.func @_margin_loss_kernel(%arg0: i32, %arg1: memref<8x32xf32, #tpu.memory_space<vmem>>, %arg2: memref<8x32xf32, #tpu.memory_space<vmem>>, %arg3: memref<1x1xf32, #tpu.memory_space<smem>>, %arg4: memref<8x8xf32, #tpu.memory_space<vmem>>, %arg5: memref<8x1xf32, #tpu.memory_space<vmem>>, %arg6: memref<1x8xf32, #tpu.memory_space<vmem>>) attributes {dimension_semantics = [#tpu.dimension_semantics<arbitrary>], iteration_bounds = array<i64: 1>, scalar_prefetch = 0 : i64, scratch_operands = 3 : i64, tpu.core_type = #tpu.core_type<tc>, window_params = [{transform_indices = @transform_0, window_bounds = array<i64: 8, 32>}, {transform_indices = @transform_1, window_bounds = array<i64: 8, 32>}, {transform_indices = @transform_2, window_bounds = array<i64: 1, 1>}]} {
    %c0_i32 = arith.constant 0 : i32
    %0 = arith.cmpi eq, %arg0, %c0_i32 : i32
    %1 = arith.extui %0 : i1 to i32
    %c0_i32_0 = arith.constant 0 : i32
    %2 = arith.cmpi ne, %1, %c0_i32_0 : i32
    scf.if %2 {
      %cst_21 = arith.constant 0.000000e+00 : f32
      %24 = vector.broadcast %cst_21 : f32 to vector<8x8xf32>
      %c0_22 = arith.constant 0 : index
      %c0_23 = arith.constant 0 : index
      %25 = vector.load %arg4[%c0_22, %c0_23] : memref<8x8xf32, #tpu.memory_space<vmem>>, vector<8x8xf32>
      tpu.vector_store %arg4[%c0_22, %c0_23], %24 {strides = array<i32>} : memref<8x8xf32, #tpu.memory_space<vmem>>, vector<8x8xf32>,
      %cst_24 = arith.constant 0.000000e+00 : f32
      %26 = vector.broadcast %cst_24 : f32 to vector<8x1xf32>
      %c0_25 = arith.constant 0 : index
      %c0_26 = arith.constant 0 : index
      %27 = vector.load %arg5[%c0_25, %c0_26] : memref<8x1xf32, #tpu.memory_space<vmem>>, vector<8x1xf32>
      tpu.vector_store %arg5[%c0_25, %c0_26], %26 {strides = array<i32>} : memref<8x1xf32, #tpu.memory_space<vmem>>, vector<8x1xf32>,
      %cst_27 = arith.constant 0.000000e+00 : f32
      %28 = vector.broadcast %cst_27 : f32 to vector<1x8xf32>
      %c0_28 = arith.constant 0 : index
      %c0_29 = arith.constant 0 : index
      %29 = vector.load %arg6[%c0_28, %c0_29] : memref<1x8xf32, #tpu.memory_space<vmem>>, vector<1x8xf32>
      tpu.vector_store %arg6[%c0_28, %c0_29], %28 {strides = array<i32>} : memref<1x8xf32, #tpu.memory_space<vmem>>, vector<1x8xf32>,
    } else {
    }
    %c0 = arith.constant 0 : index
    %c0_1 = arith.constant 0 : index
    %3 = vector.load %arg1[%c0, %c0_1] : memref<8x32xf32, #tpu.memory_space<vmem>>, vector<8x32xf32>
    %c0_2 = arith.constant 0 : index
    %c0_3 = arith.constant 0 : index
    %4 = vector.load %arg2[%c0_2, %c0_3] : memref<8x32xf32, #tpu.memory_space<vmem>>, vector<8x32xf32>
    %c0_4 = arith.constant 0 : index
    %c0_5 = arith.constant 0 : index
    %5 = vector.load %arg4[%c0_4, %c0_5] : memref<8x8xf32, #tpu.memory_space<vmem>>, vector<8x8xf32>
    %cst = arith.constant dense<0.000000e+00> : vector<8x8xf32>
    %6 = tpu.matmul %3, %4, %cst {dimension_numbers = #tpu.dot_dimension_numbers<[1], [1], [0], [0], [0, 0, 1, 0], [], []>} : vector<8x32xf32>, vector<8x32xf32>, vector<8x8xf32> -> vector<8x8xf32>
    %7 = arith.addf %5, %6 : vector<8x8xf32>
    %c0_6 = arith.constant 0 : index
    %c0_7 = arith.constant 0 : index
    %8 = vector.load %arg4[%c0_6, %c0_7] : memref<8x8xf32, #tpu.memory_space<vmem>>, vector<8x8xf32>
    tpu.vector_store %arg4[%c0_6, %c0_7], %7 {strides = array<i32>} : memref<8x8xf32, #tpu.memory_space<vmem>>, vector<8x8xf32>,
    %c0_8 = arith.constant 0 : index
    %c0_9 = arith.constant 0 : index
    %9 = vector.load %arg5[%c0_8, %c0_9] : memref<8x1xf32, #tpu.memory_space<vmem>>, vector<8x1xf32>
    %10 = arith.mulf %3, %3 : vector<8x32xf32>
    %cst_10 = arith.constant dense<0.000000e+00> : vector<8xf32>
    %11 = vector.multi_reduction <add>, %10, %cst_10 [1] : vector<8x32xf32> to vector<8xf32>
    %12 = vector.shape_cast %11 : vector<8xf32> to vector<8x1xf32>
    %13 = arith.addf %9, %12 : vector<8x1xf32>
    %c0_11 = arith.constant 0 : index
    %c0_12 = arith.constant 0 : index
    %14 = vector.load %arg5[%c0_11, %c0_12] : memref<8x1xf32, #tpu.memory_space<vmem>>, vector<8x1xf32>
    tpu.vector_store %arg5[%c0_11, %c0_12], %13 {strides = array<i32>} : memref<8x1xf32, #tpu.memory_space<vmem>>, vector<8x1xf32>,
    %cst_13 = arith.constant 1.000000e+00 : f32
    %15 = vector.broadcast %cst_13 : f32 to vector<1x32xf32>
    %c0_14 = arith.constant 0 : index
    %c0_15 = arith.constant 0 : index
    %16 = vector.load %arg6[%c0_14, %c0_15] : memref<1x8xf32, #tpu.memory_space<vmem>>, vector<1x8xf32>
    %17 = arith.mulf %4, %4 : vector<8x32xf32>
    %cst_16 = arith.constant dense<0.000000e+00> : vector<1x8xf32>
    %18 = tpu.matmul %15, %17, %cst_16 {dimension_numbers = #tpu.dot_dimension_numbers<[1], [1], [0], [0], [0, 0, 1, 0], [], []>} : vector<1x32xf32>, vector<8x32xf32>, vector<1x8xf32> -> vector<1x8xf32>
    %19 = arith.addf %16, %18 : vector<1x8xf32>
    %c0_17 = arith.constant 0 : index
    %c0_18 = arith.constant 0 : index
    %20 = vector.load %arg6[%c0_17, %c0_18] : memref<1x8xf32, #tpu.memory_space<vmem>>, vector<1x8xf32>
    tpu.vector_store %arg6[%c0_17, %c0_18], %19 {strides = array<i32>} : memref<1x8xf32, #tpu.memory_space<vmem>>, vector<1x8xf32>,
    %c0_i32_19 = arith.constant 0 : i32
    %21 = arith.cmpi eq, %arg0, %c0_i32_19 : i32
    %22 = arith.extui %21 : i1 to i32
    %c0_i32_20 = arith.constant 0 : i32
    %23 = arith.cmpi ne, %22, %c0_i32_20 : i32
    scf.if %23 {
      %c0_21 = arith.constant 0 : index
      %c0_22 = arith.constant 0 : index
      %24 = vector.load %arg5[%c0_21, %c0_22] : memref<8x1xf32, #tpu.memory_space<vmem>>, vector<8x1xf32>
      %cst_23 = arith.constant 1.000000e-24 : f32
      %25 = vector.broadcast %cst_23 : f32 to vector<8x1xf32>
      %26 = arith.maximumf %24, %25 : vector<8x1xf32>
      %27 = math.rsqrt %26 : vector<8x1xf32>
      %c0_24 = arith.constant 0 : index
      %c0_25 = arith.constant 0 : index
      %28 = vector.load %arg6[%c0_24, %c0_25] : memref<1x8xf32, #tpu.memory_space<vmem>>, vector<1x8xf32>
      %cst_26 = arith.constant 1.000000e-24 : f32
      %29 = vector.broadcast %cst_26 : f32 to vector<1x8xf32>
      %30 = arith.maximumf %28, %29 : vector<1x8xf32>
      %31 = math.rsqrt %30 : vector<1x8xf32>
      %c0_27 = arith.constant 0 : index
      %c0_28 = arith.constant 0 : index
      %32 = vector.load %arg4[%c0_27, %c0_28] : memref<8x8xf32, #tpu.memory_space<vmem>>, vector<8x8xf32>
      %33 = vector.broadcast %27 : vector<8x1xf32> to vector<8x8xf32>
      %34 = arith.mulf %32, %33 : vector<8x8xf32>
      %35 = vector.broadcast %31 : vector<1x8xf32> to vector<8x8xf32>
      %36 = arith.mulf %34, %35 : vector<8x8xf32>
      %37 = tpu.iota {dimensions = array<i32: 0>} : vector<8x8xi32>
      %38 = tpu.iota {dimensions = array<i32: 1>} : vector<8x8xi32>
      %39 = arith.cmpi eq, %37, %38 : vector<8x8xi32>
      %cst_29 = arith.constant 1.000000e+00 : f32
      %cst_30 = arith.constant -1.000000e+00 : f32
      %40 = vector.broadcast %cst_29 : f32 to vector<8x8xf32>
      %41 = vector.broadcast %cst_30 : f32 to vector<8x8xf32>
      %42 = arith.select %39, %40, %41 : vector<8x8xi1>, vector<8x8xf32>
      %43 = arith.subf %36, %42 : vector<8x8xf32>
      %44 = arith.mulf %43, %43 : vector<8x8xf32>
      %45 = vector.shape_cast %44 : vector<8x8xf32> to vector<1x8x8xf32>
      %cst_31 = arith.constant dense<0.000000e+00> : vector<1xf32>
      %46 = vector.multi_reduction <add>, %45, %cst_31 [1, 2] : vector<1x8x8xf32> to vector<1xf32>
      %47 = vector.shape_cast %46 : vector<1xf32> to vector<1x1x1xf32>
      %48 = vector.extract %47[0, 0, 0] : f32 from vector<1x1x1xf32>
      %cst_32 = arith.constant 1.562500e-02 : f32
      %49 = arith.mulf %48, %cst_32 : f32
      %c0_33 = arith.constant 0 : index
      %c0_34 = arith.constant 0 : index
      %50 = memref.load %arg3[%c0_33, %c0_34] : memref<1x1xf32, #tpu.memory_space<smem>>
      memref.store %49, %arg3[%c0_33, %c0_34] : memref<1x1xf32, #tpu.memory_space<smem>>
    } else {
    }
    return
  }
  func.func @transform_0(%arg0: i32) -> (i32, i32) {
    %c0_i32 = arith.constant 0 : i32
    %c0_i32_0 = arith.constant 0 : i32
    return %c0_i32, %arg0 : i32, i32
  }
  func.func @transform_1(%arg0: i32) -> (i32, i32) {
    %c0_i32 = arith.constant 0 : i32
    %c0_i32_0 = arith.constant 0 : i32
    return %c0_i32, %arg0 : i32, i32
  }
  func.func @transform_2(%arg0: i32) -> (i32, i32) {
    %c0_i32 = arith.constant 0 : i32
    %c0_i32_0 = arith.constant 0 : i32
    %c0_i32_1 = arith.constant 0 : i32
    return %c0_i32, %c0_i32_0 : i32, i32
  }
}

</mosaic_0001>

<bundles_post_ra>
// kernel: margin_loss.1
= control target key start
LH: loop header
LB: loop body
LE: loop exit
PB: predicated region body
PF: predicated region fallthrough
CT: control target
= control target key end

     0   :  { %7 = vsyncpa [#allocation6], 0  ;;  %s403_s0 = inlined_call_operand.hbm [shape: f32[8,32], index: 0, kind: input, shape index: {}]   ;;  %s404_s1 = inlined_call_operand.hbm [shape: f32[8,32], index: 1, kind: input, shape index: {}]   ;;  %s405_s2 = inlined_call_operand.hbm [shape: f32[1,1], index: 2, kind: output, shape index: {}]  }
   0x1   :  { %8 = vsyncpa [#allocation9], 0 }
   0x2   :  { %9 = vsyncpa [#allocation7], 0  ;;  %s364_s9 = smov [#allocation5]   ;;  %s365_s11 = smov [#allocation8]  }
   0x3   :  { %s16_s10 = sshll.u32 %s364_s9, 4  ;;  %s26_s12 = sshll.u32 %s365_s11, 4  ;;  %s17_s10 = int_to_ptr.vmem [resolvable:$true] %s16_s10  ;;  %s27_s12 = int_to_ptr.vmem [resolvable:$true] %s26_s12 }
   0x4   :  { %s318_s13 = scalar_lea.vmem %s17_s10, 128  ;;  %p323_p1 = scmp.lt.s32.totalorder %s17_s10, %s17_s10 }
   0x5   :  { %p319_p0 = scmp.ne.s32.totalorder %s17_s10, %s318_s13  ;;  %p324_p2 = scmp.lt.s32.totalorder %s318_s13, %s318_s13 }
   0x7   :  { %p325_p3 = por %p324_p2, %p323_p1 }
   0x9   :  { %p326_p4 = pnand %p325_p3, %p319_p0 }
   0xb   :  { %329 = shalt.err (!%p326_p4)
}
   0xc   :  { %19 = dma.hbm_to_vmem [thread:$0]  %s403_s0, 128, %s17_s10, [#allocation6]  }
   0xd   :  { %s338_s16 = scalar_lea.vmem %s27_s12, 128  ;;  %p343_p6 = scmp.lt.s32.totalorder %s27_s12, %s27_s12 }
   0xe   :  { %p339_p5 = scmp.ne.s32.totalorder %s27_s12, %s338_s16  ;;  %p344_p7 = scmp.lt.s32.totalorder %s338_s16, %s338_s16 }
  0x10   :  { %p345_p8 = por %p344_p7, %p343_p6 }
  0x12   :  { %p346_p9 = pnand %p345_p8, %p339_p5 }
  0x14   :  { %349 = shalt.err (!%p346_p9)
}
  0x15   :  { %29 = dma.hbm_to_vmem [thread:$0]  %s404_s1, 128, %s27_s12, [#allocation9]  }
  0x16   :  { %358 = dma.done.wait [#allocation6], 128  }
  0x17   :  { %359 = vsyncadd [#allocation6], 4294967168 }
  0x18   :  { %360 = dma.done.wait [#allocation9], 128  }
  0x19   :  { %361 = vsyncadd [#allocation9], 4294967168  ;;  %v366_v0 = vmov 0.0   ;;  %vm367_vm0 = vmmov 0   ;;  %vm42_vm1 = vcmask 7168   ;;  %v46_v1 = vld [vmem:[#allocation5] sm:$0xff]  ;;  %v235_v24 = vlaneseq }
  0x1a   :  { %290 = vmatprep.subr.mxu1 %v366_v0  ;;  %292 = vmatprep.mubr.msk.f32.mxu1 %vm367_vm0, %v366_v0  ;;  %43 = vst.msk [vmem:[#allocation3] sm:$0xff] %vm42_vm1, %v366_v0  ;;  %vm49_vm2 = vcmask 261120   ;;  %v47_v2 = vld [vmem:[#allocation8] sm:$0xff]  ;;  %v130_v3 = vmul.f32 %v46_v1, %v46_v1  ;;  %v368_v6 = vmov 1.0   ;;  %v369_v7 = vmov 0   ;;  %s371_s19 = smov [#allocation10]  }
  0x1b   :  { %285 = vmatprep.subr.mxu0 %v366_v0  ;;  %287 = vmatprep.mubr.msk.f32.mxu0 %vm367_vm0, %v366_v0  ;;  %v138_v4 = vmul.f32 %v47_v2, %v47_v2  ;;  %vm44_vm3 = vcmask 57344   ;;  %vm40_vm4 = vcmask 64512   ;;  %v236_v25 = vshrl.u32 %v235_v24, 7 }
  0x1c   :  { %286 = vmatpush3.xpose.msk.msra.mxu0 %vm49_vm2, %v47_v2  ;;  %v131_v5 = vsel %vm49_vm2, %v130_v3, 0.0  ;;  %305 = vset.pattern.permute.xlu0 %v369_v7  ;;  %45 = vst.msk [vmem:[#allocation4] sm:$0x1] %vm44_vm3, %v366_v0  ;;  %v244_v27 = vand.u32 127, %v235_v24  ;;  %v370_v33 = vmov -1.0  }
  0x1d   :  { %291 = vmatpush3.xpose.msk.msra.mxu1 %vm49_vm2, %v138_v4  ;;  %132 = vadd.xlane.f32.xlu0 %v131_v5  ;;  %41 = vst.msk [vmem:[#allocation2] sm:$0xff] %vm40_vm4, %v366_v0  ;;  %v237_v26 = vsub.s32 0, %v236_v25 }
  0x1e   :  { %vm245_vm5 = vcmp.eq.s32.totalorder %v236_v25, %v244_v27 }
  0x1f   :  { %288 = vmatmul.mubr.msk.f32.vlgmr.msra.gmra.mxu0 %vm49_vm2, %v46_v1  ;;  %v246_v34 = vsel %vm245_vm5, 1.0, %v370_v33 }
  0x20   :  { %293 = vmatmul.mubr.msk.f32.vlgmr.msra.gmra.mxu1 %vm49_vm2, %v368_v6 }
  0x21   :  { %v129_v8 = vld [vmem:[#allocation3] sm:$0xff] }
  0x23   :  { %v137_v15 = vld [vmem:[#allocation4] sm:$0x1] }
  0x24   :  { %v48_v14 = vld [vmem:[#allocation2] sm:$0xff] }
  0xa6   :  { %v133_v9 = vpop.xlane.xlu0 %132 }
  0xa7   :  { %v134_v10 = vadd.f32 %v133_v9, %v129_v8 }
  0xa9   :  { %136 = vst.msk [vmem:[#allocation3] sm:$0xff] %vm42_vm1, %v134_v10 }
  0xb0   :  { %v221_v11 = vld [vmem:[#allocation3] sm:$0xff] }
  0xb1   :  { %v222_v12 = vmax.f32 %v221_v11, 1e-24 }
  0xb3   :  { %306 = vrsqrt.f32 %v222_v12 }
  0xc0   :  { %v307_v13 = vpop.eup %306 }
  0xc1   :  { %230 = vperm.xlu0 %305, %v307_v13  }
  0xdf   :  { %v122_v16 = vpop.f32.mrf.mxu0 }
  0xe0   :  { %v126_v17 = vadd.f32 %v122_v16, %v48_v14  ;;  %v211_v18 = vpop.f32.mrf.mxu1 }
  0xe1   :  { %v289_v19 = vpop.f32.mrf.mxu0  ;;  %v215_v20 = vadd.f32 %v211_v18, %v137_v15 }
  0xe2   :  { %128 = vst.msk [vmem:[#allocation2] sm:$0xff] %vm40_vm4, %v126_v17  ;;  %v294_v21 = vpop.f32.mrf.mxu1 }
  0xe3   :  { %217 = vst.msk [vmem:[#allocation4] sm:$0x1] %vm44_vm3, %v215_v20 }
  0xe9   :  { %v227_v29 = vld [vmem:[#allocation2] sm:$0xff] }
  0xea   :  { %v224_v22 = vld [vmem:[#allocation4] sm:$0x1] }
  0xeb   :  { %v225_v23 = vmax.f32 %v224_v22, 1e-24 }
  0xed   :  { %308 = vrsqrt.f32 %v225_v23 }
  0xfa   :  { %v309_v28 = vpop.eup %308 }
  0xfb   :  { %v238_v30 = vrot.slane %v309_v28, %v237_v26 }
 0x13c   :  { %v231_v31 = vpop.permute.xlu0 %230 }
 0x13d   :  { %v233_v32 = vmul.f32 %v231_v31, %v227_v29 }
 0x13f   :  { %v240_v35 = vmul.f32 %v238_v30, %v233_v32 }
 0x141   :  { %v247_v36 = vsub.f32 %v240_v35, %v246_v34 }
 0x143   :  { %v248_v37 = vmul.f32 %v247_v36, %v247_v36 }
 0x145   :  { %v249_v38 = vsel %vm40_vm4, %v248_v37, 0.0 }
 0x146   :  { %250 = vadd.xlane.f32.xlu1 %v249_v38 }
 0x1cf   :  { %v251_v39 = vpop.xlane.xlu1 %250 }
 0x1d0   :  { %v252_v40 = vrot.slane %v251_v39, 4 }
 0x1d2   :  { %v253_v41 = vadd.f32 %v252_v40, %v251_v39 }
 0x1d4   :  { %v254_v42 = vrot.slane %v253_v41, 2 }
 0x1d6   :  { %v255_v43 = vadd.f32 %v254_v42, %v253_v41 }
 0x1d8   :  { %v256_v44 = vrot.slane %v255_v43, 1 }
 0x1da   :  { %v257_v45 = vadd.f32 %v256_v44, %v255_v43 }
 0x1dc   :  { %295 = vpush %v257_v45 }
 0x20d   :  { %s296_s0 = spop %295 }
 0x20e   :  { %s259_s1 = smul.f32 0.015625, %s296_s0 }
 0x210   :  { %261 = sst [smem:[#allocation10]] %s259_s1 }
 0x211   :  { %269 = dma.smem_to_hbm %s371_s19, 16, %s405_s2, [#allocation7]  }
 0x212   :  { %362 = dma.done.wait [#allocation7], 16  }
 0x213   :  { %363 = vsyncadd [#allocation7], 4294967280 }
 0x214   :  { %273 = sfence }
 0x215   :  { %274 = vsyncpa [#allocation6], 1 }
 0x216   :  { %275 = vsyncpa [#allocation9], 1 }
 0x217   :  { %276 = vsyncpa [#allocation7], 1 }

</bundles_post_ra>
